<compile_context>
chip_gen: v6e
topology: v6e:2x2x1
jax: 0.10.0
libtpu: 0.0.40
codegen_flags: <defaults>
</compile_context>

<pallas_src>
import functools

import jax
import jax.numpy as jnp
import numpy as np
from jax.experimental import pallas as pl
from jax.experimental.pallas import tpu as pltpu


# ----------------------------- Pallas kernel -------------------------------
def _dynconv_kernel(w_ref, a_ref, o_ref):
    """One (batch, spatial-tile) output block; reduction over k*k offsets.

    w_ref: (1, Co_pad, Ci)      bf16   weight slice for this kh/kw offset
    a_ref: (1, 1, Ci, T_hw)     bf16   activation slice (spatial on lanes)
    o_ref: (1, Co_pad, T_hw)    f32    resident output block (accumulator)
    """
    r = pl.program_id(2)  # kh*kw offset index (innermost, "arbitrary")

    @pl.when(r == 0)
    def _():
        o_ref[...] = jnp.zeros_like(o_ref)

    o_ref[0] += jnp.dot(
        w_ref[0], a_ref[0, 0], preferred_element_type=jnp.float32
    )


def _pick_hw_tile(hw):
    """Largest lane-dense tile (multiple of 128) dividing hw, else full dim."""
    if hw % 128 == 0:
        for t in (4096, 2048, 1024, 512, 256, 128):
            if hw % t == 0:
                return t
    return hw  # full extent -> always a legal block shape


def _dynamic_conv2d_pallas(x, filt):
    """x: (N, Ci, H, W) float; filt: (Co, Ci, k, k).  stride=1, VALID, no bias."""
    n, ci, h, w = x.shape
    co, ci_f, kh, kw = filt.shape
    assert ci == ci_f and kh == kw
    k = kh
    ho, wo = h - k + 1, w - k + 1
    hw = ho * wo
    kk = k * k

    # Weights: (kk, Co_pad, Ci), Co padded to a sublane multiple, bf16.
    co_pad = ((co + 7) // 8) * 8
    w_mat = jnp.transpose(filt, (2, 3, 0, 1)).reshape(kk, co, ci)
    if co_pad != co:
        w_mat = jnp.pad(w_mat, ((0, 0), (0, co_pad - co), (0, 0)))
    w_mat = w_mat.astype(jnp.bfloat16)

    # Activations: (kk, N, Ci, Ho*Wo), spatial on the lane (last) dim, bf16.
    if k == 1:
        a = x.reshape(1, n, ci, hw)              # pure view, no HBM round trip
    else:
        # TODO(synk): for k>1 this still materializes the k*k shifted views
        # once in HBM; a fully fused version needs element-offset BlockSpecs.
        a = jnp.stack(
            [x[:, :, i:i + ho, j:j + wo] for i in range(k) for j in range(k)],
            axis=0,
        ).reshape(kk, n, ci, hw)
    a = a.astype(jnp.bfloat16)

    t_hw = _pick_hw_tile(hw)

    out = pl.pallas_call(
        _dynconv_kernel,
        out_shape=jax.ShapeDtypeStruct((n, co_pad, hw), jnp.float32),
        grid_spec=pltpu.PrefetchScalarGridSpec(
            num_scalar_prefetch=0,
            grid=(n, hw // t_hw, kk),            # batch, spatial tiles, k*k
            in_specs=[
                pl.BlockSpec((1, co_pad, ci), lambda b, s, r: (r, 0, 0)),
                pl.BlockSpec((1, 1, ci, t_hw), lambda b, s, r: (r, b, 0, s)),
            ],
            out_specs=pl.BlockSpec((1, co_pad, t_hw), lambda b, s, r: (b, 0, s)),
        ),
        compiler_params=pltpu.CompilerParams(
            dimension_semantics=("parallel", "parallel", "arbitrary"),
        ),
    )(w_mat, a)

    # (N, Co_pad, HW) -> (N, Co, Ho, Wo); output already channel-major (NCHW).
    return out.reshape(n, co_pad, ho, wo)[:, :co]


_dynamic_conv2d_jit = jax.jit(_dynamic_conv2d_pallas)


# --------------------------- module equivalent ------------------------------
class DynamicConv2d:
    """JAX/Pallas port of the PyTorch DynamicConv2d forward (bias=False)."""

    def __init__(self, max_in_channels, max_out_channels, kernel_size=1,
                 key=jax.random.PRNGKey(42)):
        self.max_in_channels = max_in_channels
        self.max_out_channels = max_out_channels
        self.kernel_size = kernel_size
        # PyTorch Conv2d default init: uniform(-b, b), b = 1/sqrt(fan_in).
        fan_in = max_in_channels * kernel_size * kernel_size
        bound = 1.0 / np.sqrt(fan_in)
        self.weight = jax.random.uniform(
            key,
            (max_out_channels, max_in_channels, kernel_size, kernel_size),
            minval=-bound, maxval=bound, dtype=jnp.float32,
        )
        self.active_out_channel = max_out_channels

    def get_active_filter(self, out_channel, in_channel):
        return self.weight[:out_channel, :in_channel, :, :]

    def __call__(self, x, out_channel=None):
        # x: (N, C_in, H, W)
        if out_channel is None:
            out_channel = self.active_out_channel
        in_channel = x.shape[1]
        # NOTE: each distinct (out_channel, in_channel) pair is a new static
        # shape -> separate compile; fine for a handful of configurations.
        filt = self.get_active_filter(out_channel, in_channel)
        return _dynamic_conv2d_jit(x, filt)       # (N, Co, Ho, Wo), float32


# --------------------------------- main --------------------------------------
if __name__ == "__main__":
    key = jax.random.PRNGKey(0)
    # max channels 8, active input channels 4 (dynamic slicing of the filter).
    x = jax.random.normal(key, (2, 4, 16, 16), dtype=jnp.float32)

    layer = DynamicConv2d(max_in_channels=8, max_out_channels=8, kernel_size=1)
    layer.active_out_channel = 6  # exercise dynamic out-channel selection

    y = layer(x)                  # -> (2, 6, 16, 16)
    y = jax.block_until_ready(y)

    # Reference: identical bf16-rounded operands, f32 math (mirrors the
    # kernel's bf16 MXU multiply + f32 accumulate), via XLA conv.
    filt = layer.get_active_filter(6, 4)
    x_bf = x.astype(jnp.bfloat16).astype(jnp.float32)
    w_bf = filt.astype(jnp.bfloat16).astype(jnp.float32)
    y_ref = jax.lax.conv_general_dilated(
        x_bf, w_bf, window_strides=(1, 1), padding="VALID",
        dimension_numbers=("NCHW", "OIHW", "NCHW"),
    )
    np.testing.assert_allclose(np.asarray(y), np.asarray(y_ref),
                               rtol=1e-5, atol=1e-5)
    assert y.shape == (2, 6, 16, 16)

    print("KERNEL_OK")
</pallas_src>

<mosaic_0001>
module attributes {stable_mosaic.version = 11 : i64} {
  func.func @_dynconv_kernel(%arg0: i32, %arg1: i32, %arg2: i32, %arg3: memref<1x8x4xbf16, #tpu.memory_space<vmem>>, %arg4: memref<1x1x4x256xbf16, #tpu.memory_space<vmem>>, %arg5: memref<1x8x256xf32, #tpu.memory_space<vmem>>) attributes {dimension_semantics = [#tpu.dimension_semantics<parallel>, #tpu.dimension_semantics<parallel>, #tpu.dimension_semantics<arbitrary>], iteration_bounds = array<i64: 2, 1, 1>, scalar_prefetch = 0 : i64, scratch_operands = 0 : i64, tpu.core_type = #tpu.core_type<tc>, window_params = [{transform_indices = @transform_0, window_bounds = array<i64: 1, 8, 4>}, {transform_indices = @transform_1, window_bounds = array<i64: 1, 1, 4, 256>}, {transform_indices = @transform_2, window_bounds = array<i64: 1, 8, 256>}]} {
    %c0_i32 = arith.constant 0 : i32
    %0 = arith.cmpi eq, %arg2, %c0_i32 : i32
    %1 = arith.extui %0 : i1 to i32
    %c0_i32_0 = arith.constant 0 : i32
    %2 = arith.cmpi ne, %1, %c0_i32_0 : i32
    scf.if %2 {
      %cst_13 = arith.constant 0.000000e+00 : f32
      %14 = vector.broadcast %cst_13 : f32 to vector<1x8x256xf32>
      %c0_14 = arith.constant 0 : index
      %c0_15 = arith.constant 0 : index
      %c0_16 = arith.constant 0 : index
      %15 = vector.load %arg5[%c0_14, %c0_15, %c0_16] : memref<1x8x256xf32, #tpu.memory_space<vmem>>, vector<1x8x256xf32>
      tpu.vector_store %arg5[%c0_14, %c0_15, %c0_16], %14 {strides = array<i32>} : memref<1x8x256xf32, #tpu.memory_space<vmem>>, vector<1x8x256xf32>,
    } else {
    }
    %c0 = arith.constant 0 : index
    %c0_1 = arith.constant 0 : index
    %c0_2 = arith.constant 0 : index
    %3 = vector.load %arg5[%c0, %c0_1, %c0_2] : memref<1x8x256xf32, #tpu.memory_space<vmem>>, vector<1x8x256xf32>
    %4 = vector.shape_cast %3 : vector<1x8x256xf32> to vector<8x256xf32>
    %c0_3 = arith.constant 0 : index
    %c0_4 = arith.constant 0 : index
    %c0_5 = arith.constant 0 : index
    %5 = vector.load %arg3[%c0_3, %c0_4, %c0_5] : memref<1x8x4xbf16, #tpu.memory_space<vmem>>, vector<1x8x4xbf16>
    %6 = vector.shape_cast %5 : vector<1x8x4xbf16> to vector<8x4xbf16>
    %c0_6 = arith.constant 0 : index
    %c0_7 = arith.constant 0 : index
    %c0_8 = arith.constant 0 : index
    %c0_9 = arith.constant 0 : index
    %7 = vector.load %arg4[%c0_6, %c0_7, %c0_8, %c0_9] : memref<1x1x4x256xbf16, #tpu.memory_space<vmem>>, vector<1x1x4x256xbf16>
    %8 = vector.shape_cast %7 : vector<1x1x4x256xbf16> to vector<4x256xbf16>
    %cst = arith.constant dense<0.000000e+00> : vector<8x256xf32>
    %9 = tpu.matmul %6, %8, %cst {dimension_numbers = #tpu.dot_dimension_numbers<[1], [0], [0], [1], [0, 0, 1, 1], [], []>} : vector<8x4xbf16>, vector<4x256xbf16>, vector<8x256xf32> -> vector<8x256xf32>
    %10 = arith.addf %4, %9 : vector<8x256xf32>
    %c0_10 = arith.constant 0 : index
    %c0_11 = arith.constant 0 : index
    %c0_12 = arith.constant 0 : index
    %11 = vector.load %arg5[%c0_10, %c0_11, %c0_12] : memref<1x8x256xf32, #tpu.memory_space<vmem>>, vector<1x8x256xf32>
    %12 = vector.shape_cast %11 : vector<1x8x256xf32> to vector<8x256xf32>
    %13 = vector.shape_cast %10 : vector<8x256xf32> to vector<1x8x256xf32>
    tpu.vector_store %arg5[%c0_10, %c0_11, %c0_12], %13 {strides = array<i32>} : memref<1x8x256xf32, #tpu.memory_space<vmem>>, vector<1x8x256xf32>,
    return
  }
  func.func @transform_0(%arg0: i32, %arg1: i32, %arg2: i32) -> (i32, i32, i32) {
    %c0_i32 = arith.constant 0 : i32
    %c0_i32_0 = arith.constant 0 : i32
    %c0_i32_1 = arith.constant 0 : i32
    return %arg2, %c0_i32, %c0_i32_0 : i32, i32, i32
  }
  func.func @transform_1(%arg0: i32, %arg1: i32, %arg2: i32) -> (i32, i32, i32, i32) {
    %c0_i32 = arith.constant 0 : i32
    %c0_i32_0 = arith.constant 0 : i32
    return %arg2, %arg0, %c0_i32, %arg1 : i32, i32, i32, i32
  }
  func.func @transform_2(%arg0: i32, %arg1: i32, %arg2: i32) -> (i32, i32, i32) {
    %c0_i32 = arith.constant 0 : i32
    %c0_i32_0 = arith.constant 0 : i32
    return %arg0, %c0_i32, %arg1 : i32, i32, i32
  }
}

</mosaic_0001>

<bundles_post_ra>
// kernel: _dynamic_conv2d_pallas.1
= control target key start
LH: loop header
LB: loop body
LE: loop exit
PB: predicated region body
PF: predicated region fallthrough
CT: control target
= control target key end

     0   :  { %s491_s9 = smov 0   ;;  %s493_s10 = smov 0   ;;  %s527_s0 = inlined_call_operand.vmem [shape: bf16[1,8,4], index: 0, kind: input, shape index: {}]   ;;  %s528_s1 = inlined_call_operand.vmem [shape: bf16[1,2,4,256], index: 1, kind: input, shape index: {}]   ;;  %s529_s2 = inlined_call_operand.vmem [shape: f32[2,8,256], index: 2, kind: output, shape index: {}]  }
   0x1   :  { %s495_s11 = smov 0  }
   0x2 LB: > { %s31_s12 = sadd.s32 1, %s469_s10  ;;  %p413_p0 = scmp.ge.s32.totalorder %s473_s11, 1  ;;  %s473_s11 = sphi %s495_s11, %s12_s11   ;;  %s469_s10 = sphi %s493_s10, %s531_s10   ;;  %s465_s9 = sphi %s491_s9, %s530_s9  }
   0x3   : > { %p33_p1 = scmp.ge.s32.totalorder %s31_s12, 2  ;;  %p155_p2 = scmp.lt.s32.totalorder %s473_s11, 3 }
   0x5   : > { %s533_s12 = smov (%p33_p1, %s31_s12), 0  ;;  %p156_p3 = pnand %p413_p0, %p155_p2 }
   0x6   : > { %p200_p4 = scmp.lt.s32.totalorder (!%p156_p3), %s465_s9, 1 }
   0x7   : > { %159 = sbr.rel (%p156_p3) target bundleno = 221 (0xdd), region = 28 }
   0xc   : > { %v475_v0 = vmov 0   ;;  %s535_s9 = smov (!%p200_p4, %s465_s9), 1  ;;  %vm245_vm0 = vcmask 1041408   ;;  %v230_v4 = vld [vmem:[%s527_s0] sm:$0xf]  ;;  %vm241_vm1 = vcmask 31744  }
   0xd   : > { %284 = vmatprep.mubr.bf16.mxu0 %v475_v0  ;;  %s423_s13 = sshll.u32 %s535_s9, 2  ;;  %s424_s19 = sshll.u32 %s535_s9, 4 }
   0xe   : > { %s209_s16 = scalar_lea.vmem %s528_s1, %s423_s13  ;;  %s219_s22 = scalar_lea.vmem %s529_s2, %s424_s19 }
   0xf   : > { %v418_v1 = vld.sshfl [vmem:[%s209_s16] sm:$0x33 pattern:$0x76325410] }
  0x10   : > { %v240_v2 = vcombine.high %v418_v1, %v418_v1  ;;  %v247_v3 = vsel %vm245_vm0, %v418_v1, 0 }
  0x12   : > { %419 = vmatprep.subr.msk.bf16.mxu0 %vm245_vm0, %v240_v2 }
  0x13   : > { %267 = vmatpush1.bf16.msra.mxu0 %v247_v3 }
  0x16   : > { %420 = vmatmul.mubr.msk.bf16.vlgmr.msra.gmra.mxu0 %vm241_vm1, %v230_v4 }
  0xd6   : > { %v286_v5 = vpop.f32.mrf.mxu0 }
  0xd7   : > { %295 = vst [vmem:[%s219_s22] sm:$0xff] %v286_v5 }
  0xd8   : > { %v288_v6 = vpop.f32.mrf.mxu0 }
  0xd9   : > { %296 = vst [vmem:[%s219_s22 + $0x8] sm:$0xff] %v288_v6 }
  0xda   : > { %v290_v7 = vpop.f32.mrf.mxu0 }
  0xdc   : > { %v291_v8 = vpop.f32.mrf.mxu0 }
  0xdd PF: > { %s12_s11 = sadd.s32 1, %s473_s11   ;;  %s530_s9 = smov %s469_s10 }
  0xde   : > { %p9_p5 = scmp.ge.s32.totalorder %s12_s11, 4   ;;  %s531_s10 = smov %s533_s12 }
  0xe0   :  { %11 = sbr.rel (!%p9_p5) target bundleno = 2 (0x2), region = 65 }

</bundles_post_ra>
